<compile_context>
chip_gen: v6e
topology: v6e:2x2x1
jax: 0.10.0
libtpu: 0.0.40
codegen_flags: <defaults>
</compile_context>

<pallas_src>
import jax
import jax.numpy as jnp
from jax.experimental import pallas as pl
from jax.experimental.pallas import tpu as pltpu

IN_DIM = 20
HIDDEN = 256
OUT_DIM = 10
OUT_PAD = 128          # second-matmul N padded to a full lane width (MXU tile)
SMALL_BATCH = 1024     # below this: single grid-less call (launch overhead only)
BATCH_TILE = 4096      # max rows per grid step (review: sweep 2048-4096)


def _round_up(v: int, m: int) -> int:
    return ((v + m - 1) // m) * m


def mlp_kernel(x_ref, w1_ref, b1_ref, w2_ref, b2_ref, o_ref):
    # x_ref: (TB, 20)          w1_ref: (20, 256)       b1_ref: (1, 256)
    # w2_ref: (256, 128 pad)   b2_ref: (1, 128 pad)    o_ref: (TB, 10)
    x = x_ref[...]
    # First linear + ReLU (MXU matmul with f32 accumulation; ReLU on the VPU).
    h = jnp.dot(x, w1_ref[...], preferred_element_type=jnp.float32)
    h = jnp.maximum(h + b1_ref[...].astype(jnp.float32), 0.0)
    # Second linear at N=128: lane-dense MXU tile (W2/b2 zero-padded 10 -> 128).
    h = h.astype(w2_ref.dtype)
    y = jnp.dot(h, w2_ref[...], preferred_element_type=jnp.float32)
    y = y + b2_ref[...].astype(jnp.float32)
    # Store only the 10 real columns: HBM writeback is 40 B/row (f32) instead
    # of 512 B/row plus an external slice that re-reads everything.
    o_ref[...] = y[:, :OUT_DIM].astype(o_ref.dtype)


def prepare_params(w1, b1, w2, b2, dtype=None):
    """One-time parameter prep (hoisted out of the per-call forward).

    Zero-pads the 10-wide head to 128 output lanes so the second matmul is a
    lane-dense MXU tile, and optionally casts everything to `dtype`
    (recommended: jnp.bfloat16 for large-batch use on v5e/v6e/v7x -- halves
    the weight/activation DMA while the kernel keeps f32 accumulation).
    """
    if dtype is not None:
        w1, b1, w2, b2 = (a.astype(dtype) for a in (w1, b1, w2, b2))
    w2p = jnp.pad(w2, ((0, 0), (0, OUT_PAD - OUT_DIM)))
    b2p = jnp.pad(b2, ((0, 0), (0, OUT_PAD - OUT_DIM)))
    return w1, b1, w2p, b2p


def mlp_forward(x, w1, b1, w2p, b2p):
    """Forward pass. w2p/b2p must come from prepare_params (padded to 128)."""
    B = x.shape[0]
    cost = pl.CostEstimate(
        flops=2 * B * (IN_DIM * HIDDEN + HIDDEN * OUT_PAD),
        transcendentals=0,
        bytes_accessed=(x.size * x.dtype.itemsize
                        + w1.size * w1.dtype.itemsize
                        + b1.size * b1.dtype.itemsize
                        + w2p.size * w2p.dtype.itemsize
                        + b2p.size * b2p.dtype.itemsize
                        + B * OUT_DIM * x.dtype.itemsize),  # 10-wide store
    )

    if B <= SMALL_BATCH:
        # Small batch (e.g. the B=2 spec): one VMEM-resident block, no grid --
        # the cost is pure launch overhead.
        return pl.pallas_call(
            mlp_kernel,
            out_shape=jax.ShapeDtypeStruct((B, OUT_DIM), x.dtype),
            in_specs=[pl.BlockSpec(memory_space=pltpu.MemorySpace.VMEM)] * 5,
            out_specs=pl.BlockSpec(memory_space=pltpu.MemorySpace.VMEM),
            cost_estimate=cost,
        )(x, w1, b1, w2p, b2p)

    # Large batch: tile only the batch axis. Keep the grid >= 2 so v7x's two
    # TensorCores both get work on the "parallel" batch axis; cap the tile at
    # BATCH_TILE so double-buffered blocks stay well inside VMEM (budgeted
    # against v7x's 64 MiB physical VMEM, not v6e's 128 MiB).
    tile = min(BATCH_TILE, _round_up(pl.cdiv(B, 2), 8))
    return pl.pallas_call(
        mlp_kernel,
        out_shape=jax.ShapeDtypeStruct((B, OUT_DIM), x.dtype),
        grid=(pl.cdiv(B, tile),),
        in_specs=[
            pl.BlockSpec((tile, IN_DIM), lambda i: (i, 0)),
            # Constant block index -> weights/biases stay VMEM-resident across
            # the whole grid (no re-DMA per step).
            # TODO(synk): pipeline_mode=pl.Buffered(1) on these four specs
            # would drop their dead second buffer (~300 KiB VMEM) if the
            # installed Pallas honours it for the top-level grid pipeline.
            pl.BlockSpec((IN_DIM, HIDDEN), lambda i: (0, 0)),
            pl.BlockSpec((1, HIDDEN), lambda i: (0, 0)),
            pl.BlockSpec((HIDDEN, OUT_PAD), lambda i: (0, 0)),
            pl.BlockSpec((1, OUT_PAD), lambda i: (0, 0)),
        ],
        out_specs=pl.BlockSpec((tile, OUT_DIM), lambda i: (i, 0)),
        compiler_params=pltpu.CompilerParams(
            dimension_semantics=("parallel",),
            # ~18 MiB of live blocks at tile=4096 f32: clears v5e's 16 MiB
            # default scoped limit, leaves headroom under v7x's 64 MiB VMEM.
            vmem_limit_bytes=40 * 1024 * 1024,
        ),
        cost_estimate=cost,
    )(x, w1, b1, w2p, b2p)


def init_params(key, in_dim=IN_DIM, hidden_dim=HIDDEN, out_dim=OUT_DIM):
    # Deterministic init mimicking nn.Linear's U(-1/sqrt(fan_in), 1/sqrt(fan_in)).
    k1, k2, k3, k4 = jax.random.split(key, 4)
    bound1 = 1.0 / jnp.sqrt(in_dim)
    bound2 = 1.0 / jnp.sqrt(hidden_dim)
    w1 = jax.random.uniform(k1, (in_dim, hidden_dim), jnp.float32, -bound1, bound1)
    b1 = jax.random.uniform(k2, (1, hidden_dim), jnp.float32, -bound1, bound1)
    w2 = jax.random.uniform(k3, (hidden_dim, out_dim), jnp.float32, -bound2, bound2)
    b2 = jax.random.uniform(k4, (1, out_dim), jnp.float32, -bound2, bound2)
    return w1, b1, w2, b2


def _ref_forward(x, w1, b1, w2, b2):
    return jnp.maximum(x @ w1 + b1, 0.0) @ w2 + b2


if __name__ == "__main__":
    key = jax.random.PRNGKey(0)
    k_x, k_p, k_big = jax.random.split(key, 3)

    w1, b1, w2, b2 = init_params(k_p)

    # --- Spec shape: X = torch.rand(2, 20), f32 (grid-less path) -------------
    x = jax.random.uniform(k_x, (2, IN_DIM), jnp.float32)
    params_f32 = prepare_params(w1, b1, w2, b2)     # pad once, outside forward
    out = jax.block_until_ready(mlp_forward(x, *params_f32))
    ref = _ref_forward(x, w1, b1, w2, b2)
    assert out.shape == (2, OUT_DIM)
    assert jnp.allclose(out, ref, atol=1e-5, rtol=1e-5)

    # --- Grid-path sanity check (bf16, the recommended large-batch config) ---
    xb = jax.random.uniform(k_big, (4096, IN_DIM), jnp.float32).astype(jnp.bfloat16)
    w1b, b1b, w2bp, b2bp = prepare_params(w1, b1, w2, b2, dtype=jnp.bfloat16)
    out_big = jax.block_until_ready(mlp_forward(xb, w1b, b1b, w2bp, b2bp))
    ref_big = _ref_forward(
        xb.astype(jnp.float32),
        w1b.astype(jnp.float32), b1b.astype(jnp.float32),
        w2bp[:, :OUT_DIM].astype(jnp.float32), b2bp[:, :OUT_DIM].astype(jnp.float32),
    )
    assert out_big.shape == (4096, OUT_DIM)
    assert jnp.allclose(out_big.astype(jnp.float32), ref_big, atol=3e-2, rtol=3e-2)

    print("KERNEL_OK")
</pallas_src>

<mosaic_0001>
module attributes {stable_mosaic.version = 11 : i64} {
  func.func @mlp_kernel(%arg0: memref<2x20xf32, #tpu.memory_space<vmem>>, %arg1: memref<20x256xf32, #tpu.memory_space<vmem>>, %arg2: memref<1x256xf32, #tpu.memory_space<vmem>>, %arg3: memref<256x128xf32, #tpu.memory_space<vmem>>, %arg4: memref<1x128xf32, #tpu.memory_space<vmem>>, %arg5: memref<2x10xf32, #tpu.memory_space<vmem>>) attributes {dimension_semantics = [], scalar_prefetch = 0 : i64, scratch_operands = 0 : i64, tpu.core_type = #tpu.core_type<tc>} {
    %c0 = arith.constant 0 : index
    %c0_0 = arith.constant 0 : index
    %0 = vector.load %arg0[%c0, %c0_0] : memref<2x20xf32, #tpu.memory_space<vmem>>, vector<2x20xf32>
    %c0_1 = arith.constant 0 : index
    %c0_2 = arith.constant 0 : index
    %1 = vector.load %arg1[%c0_1, %c0_2] : memref<20x256xf32, #tpu.memory_space<vmem>>, vector<20x256xf32>
    %cst = arith.constant dense<0.000000e+00> : vector<2x256xf32>
    %2 = tpu.matmul %0, %1, %cst {dimension_numbers = #tpu.dot_dimension_numbers<[1], [0], [0], [1], [0, 0, 1, 1], [], []>} : vector<2x20xf32>, vector<20x256xf32>, vector<2x256xf32> -> vector<2x256xf32>
    %c0_3 = arith.constant 0 : index
    %c0_4 = arith.constant 0 : index
    %3 = vector.load %arg2[%c0_3, %c0_4] : memref<1x256xf32, #tpu.memory_space<vmem>>, vector<1x256xf32>
    %4 = vector.broadcast %3 : vector<1x256xf32> to vector<2x256xf32>
    %5 = arith.addf %2, %4 : vector<2x256xf32>
    %cst_5 = arith.constant 0.000000e+00 : f32
    %6 = vector.broadcast %cst_5 : f32 to vector<2x256xf32>
    %7 = arith.maximumf %5, %6 : vector<2x256xf32>
    %c0_6 = arith.constant 0 : index
    %c0_7 = arith.constant 0 : index
    %8 = vector.load %arg3[%c0_6, %c0_7] : memref<256x128xf32, #tpu.memory_space<vmem>>, vector<256x128xf32>
    %cst_8 = arith.constant dense<0.000000e+00> : vector<2x128xf32>
    %9 = tpu.matmul %7, %8, %cst_8 {dimension_numbers = #tpu.dot_dimension_numbers<[1], [0], [0], [1], [0, 0, 1, 1], [], []>} : vector<2x256xf32>, vector<256x128xf32>, vector<2x128xf32> -> vector<2x128xf32>
    %c0_9 = arith.constant 0 : index
    %c0_10 = arith.constant 0 : index
    %10 = vector.load %arg4[%c0_9, %c0_10] : memref<1x128xf32, #tpu.memory_space<vmem>>, vector<1x128xf32>
    %11 = vector.broadcast %10 : vector<1x128xf32> to vector<2x128xf32>
    %12 = arith.addf %9, %11 : vector<2x128xf32>
    %13 = vector.extract_strided_slice %12 {offsets = [0, 0], sizes = [2, 10], strides = [1, 1]} : vector<2x128xf32> to vector<2x10xf32>
    %c0_11 = arith.constant 0 : index
    %c0_12 = arith.constant 0 : index
    %14 = vector.load %arg5[%c0_11, %c0_12] : memref<2x10xf32, #tpu.memory_space<vmem>>, vector<2x10xf32>
    tpu.vector_store %arg5[%c0_11, %c0_12], %13 {strides = array<i32>} : memref<2x10xf32, #tpu.memory_space<vmem>>, vector<2x10xf32>,
    return
  }
}

</mosaic_0001>

<bundles_post_ra>
// kernel: tpu_custom_call.1
= control target key start
LH: loop header
LB: loop body
LE: loop exit
PB: predicated region body
PF: predicated region fallthrough
CT: control target
= control target key end

     0   :  { %10 = vsyncpa [#allocation3], 0  ;;  %s481_s0 = inlined_call_operand.hbm [shape: f32[2,20], index: 0, kind: input, shape index: {}]   ;;  %s482_s1 = inlined_call_operand.hbm [shape: f32[20,256], index: 1, kind: input, shape index: {}]   ;;  %s483_s2 = inlined_call_operand.vmem [shape: f32[1,256], index: 2, kind: input, shape index: {}]   ;;  %s484_s3 = inlined_call_operand.hbm [shape: f32[256,128], index: 3, kind: input, shape index: {}]   ;;  %s485_s4 = inlined_call_operand.vmem [shape: f32[1,128], index: 4, kind: input, shape index: {}]   ;;  %s486_s5 = inlined_call_operand.hbm [shape: f32[2,10], index: 5, kind: output, shape index: {}]  }
   0x1   :  { %11 = vsyncpa [#allocation6], 0 }
   0x2   :  { %12 = vsyncpa [#allocation4], 0  ;;  %s424_s18 = smov [#allocation5]  }
   0x3   :  { %s28_s19 = sshll.u32 %s424_s18, 4  ;;  %s29_s19 = int_to_ptr.vmem [resolvable:$true] %s28_s19 }
   0x4   :  { %s346_s20 = scalar_lea.vmem %s29_s19, 768  ;;  %p351_p1 = scmp.lt.s32.totalorder %s29_s19, %s29_s19 }
   0x5   :  { %p347_p0 = scmp.ne.s32.totalorder %s29_s19, %s346_s20  ;;  %p352_p2 = scmp.lt.s32.totalorder %s346_s20, %s346_s20 }
   0x7   :  { %p353_p3 = por %p352_p2, %p351_p1 }
   0x9   :  { %p354_p4 = pnand %p353_p3, %p347_p0 }
   0xb   :  { %357 = shalt.err (!%p354_p4)
}
   0xc   :  { %s425_s21 = smov 256   ;;  %s426_s22 = smov 16  }
   0xd   :  { %34 = dma.hbm_to_vmem [thread:$0]  %s482_s1, 768, %s29_s19, [#allocation6], %s425_s21, %s425_s21, %s426_s22  }
   0xe   :  { %s427_s25 = smov [#allocation2]   ;;  %s428_s27 = smov [#allocation7]  }
   0xf   :  { %s19_s26 = sshll.u32 %s427_s25, 4  ;;  %s42_s28 = sshll.u32 %s428_s27, 4  ;;  %s20_s26 = int_to_ptr.vmem [resolvable:$true] %s19_s26  ;;  %s43_s28 = int_to_ptr.vmem [resolvable:$true] %s42_s28 }
  0x10   :  { %s366_s29 = scalar_lea.vmem %s20_s26, 32  ;;  %p371_p6 = scmp.lt.s32.totalorder %s20_s26, %s20_s26 }
  0x11   :  { %p367_p5 = scmp.ne.s32.totalorder %s20_s26, %s366_s29  ;;  %p372_p7 = scmp.lt.s32.totalorder %s366_s29, %s366_s29 }
  0x13   :  { %p373_p8 = por %p372_p7, %p371_p6 }
  0x15   :  { %p374_p9 = pnand %p373_p8, %p367_p5 }
  0x17   :  { %377 = shalt.err (!%p374_p9)
}
  0x18   :  { %22 = dma.hbm_to_vmem [thread:$0]  %s481_s0, 32, %s20_s26, [#allocation3]  }
  0x19   :  { %s386_s7 = scalar_lea.vmem %s43_s28, 4096  ;;  %p391_p11 = scmp.lt.s32.totalorder %s43_s28, %s43_s28 }
  0x1a   :  { %p387_p10 = scmp.ne.s32.totalorder %s43_s28, %s386_s7  ;;  %p392_p12 = scmp.lt.s32.totalorder %s386_s7, %s386_s7 }
  0x1c   :  { %p393_p13 = por %p392_p12, %p391_p11 }
  0x1e   :  { %p394_p0 = pnand %p393_p13, %p387_p10 }
  0x20   :  { %397 = shalt.err (!%p394_p0)
}
  0x21   :  { %s429_s1 = smov 128   ;;  %s430_s8 = smov 8  }
  0x22   :  { %48 = dma.hbm_to_vmem [thread:$0]  %s484_s3, 4096, %s43_s28, [#allocation6], %s429_s1, %s429_s1, %s430_s8  }
  0x23   :  { %418 = dma.done.wait [#allocation3], 32  }
  0x24   :  { %419 = vsyncadd [#allocation3], 4294967264 }
  0x25   :  { %420 = dma.done.wait [#allocation6], 4864  }
  0x26   :  { %421 = vsyncadd [#allocation6], 4294962432  ;;  %v431_v0 = vmov 0.0   ;;  %vm83_vm0 = vcmask 1043456   ;;  %v66_v1 = vld [vmem:[#allocation5 + $0x28] sm:$0xf]  ;;  %v69_v40 = vlaneseq }
  0x27   :  { %154 = vmatprep.mubr.f32.mxu0 %v431_v0  ;;  %v65_v2 = vld [vmem:[#allocation5 + $0x20] sm:$0xf]  ;;  %v64_v3 = vld [vmem:[#allocation5 + $0x18] sm:$0xff]  ;;  %290 = vmatprep.subr.msk.mxu0 %vm83_vm0, %v66_v1  ;;  %v63_v4 = vld [vmem:[#allocation5 + $0x10] sm:$0xff]  ;;  %vm79_vm1 = vcmask 162816   ;;  %s432_s13 = smov [#allocation8]  }
  0x28   :  { %291 = vmatpush1.msk.msra.mxu0 %vm83_vm0, %v65_v2  ;;  %v62_v5 = vld [vmem:[#allocation5 + $0x8] sm:$0xff]  ;;  %v61_v8 = vld [vmem:[#allocation5] sm:$0xff]  ;;  %v60_v11 = vld [vmem:[#allocation2] sm:$0x3]  ;;  %v70_v41 = vshrl.u32 %v69_v40, 7  ;;  %s280_s14 = sshll.u32 %s432_s13, 4  ;;  %s281_s14 = int_to_ptr.vmem [resolvable:$true] %s280_s14 }
  0x29   :  { %v194_v6 = vld [vmem:[#allocation7 + $0xf8] sm:$0xff]  ;;  %118 = vmatprep.subr.mxu0 %v64_v3  ;;  %v193_v9 = vld [vmem:[#allocation7 + $0xf0] sm:$0xff]  ;;  %v192_v12 = vld [vmem:[#allocation7 + $0xe8] sm:$0xff]  ;;  %vm272_vm2 = vcmask 74752   ;;  %p403_p2 = scmp.lt.s32.totalorder %s281_s14, %s281_s14 }
  0x2a   :  { %v178_v7 = vld [vmem:[#allocation7 + $0x78] sm:$0xff]  ;;  %294 = vmatprep.subr.mxu1 %v194_v6  ;;  %v177_v10 = vld [vmem:[#allocation7 + $0x70] sm:$0xff]  ;;  %119 = vmatpush1.msra.mxu0 %v63_v4  ;;  %v176_v13 = vld [vmem:[#allocation7 + $0x68] sm:$0xff]  ;;  %v71_v42 = vsub.s32 0, %v70_v41  ;;  %v75_v44 = vsub.s32 1, %v70_v41 }
  0x2b   :  { %295 = vmatpush3.msra.mxu1 %v178_v7  ;;  %120 = vmatprep.subr.mxu0 %v62_v5  ;;  %v191_v14 = vld [vmem:[#allocation7 + $0xe0] sm:$0xff]  ;;  %v190_v16 = vld [vmem:[#allocation7 + $0xd8] sm:$0xff]  ;;  %v189_v18 = vld [vmem:[#allocation7 + $0xd0] sm:$0xff] }
  0x2c   :  { %296 = vmatprep.subr.mxu1 %v193_v9  ;;  %121 = vmatpush1.msra.mxu0 %v61_v8  ;;  %v175_v15 = vld [vmem:[#allocation7 + $0x60] sm:$0xff]  ;;  %v174_v17 = vld [vmem:[#allocation7 + $0x58] sm:$0xff]  ;;  %v173_v19 = vld [vmem:[#allocation7 + $0x50] sm:$0xff] }
  0x2d   :  { %297 = vmatpush3.msra.mxu1 %v177_v10  ;;  %292 = vmatmul.mubr.msk.f32.vlgmr.msra.gmra.mxu0 %vm79_vm1, %v60_v11  ;;  %v188_v20 = vld [vmem:[#allocation7 + $0xc8] sm:$0xff]  ;;  %v187_v22 = vld [vmem:[#allocation7 + $0xc0] sm:$0xff]  ;;  %v186_v24 = vld [vmem:[#allocation7 + $0xb8] sm:$0xff] }
  0x2e   :  { %298 = vmatprep.subr.mxu1 %v192_v12  ;;  %v172_v21 = vld [vmem:[#allocation7 + $0x48] sm:$0xff]  ;;  %v171_v23 = vld [vmem:[#allocation7 + $0x40] sm:$0xff]  ;;  %v170_v25 = vld [vmem:[#allocation7 + $0x38] sm:$0xff] }
  0x2f   :  { %299 = vmatpush3.msra.mxu1 %v176_v13  ;;  %v185_v26 = vld [vmem:[#allocation7 + $0xb0] sm:$0xff]  ;;  %v184_v28 = vld [vmem:[#allocation7 + $0xa8] sm:$0xff]  ;;  %v183_v30 = vld [vmem:[#allocation7 + $0xa0] sm:$0xff] }
  0x30   :  { %300 = vmatprep.subr.mxu1 %v191_v14  ;;  %v169_v27 = vld [vmem:[#allocation7 + $0x30] sm:$0xff]  ;;  %v168_v29 = vld [vmem:[#allocation7 + $0x28] sm:$0xff]  ;;  %v167_v31 = vld [vmem:[#allocation7 + $0x20] sm:$0xff] }
  0x31   :  { %301 = vmatpush3.msra.mxu1 %v175_v15  ;;  %v182_v32 = vld [vmem:[#allocation7 + $0x98] sm:$0xff]  ;;  %v181_v34 = vld [vmem:[#allocation7 + $0x90] sm:$0xff]  ;;  %v180_v36 = vld [vmem:[#allocation7 + $0x88] sm:$0xff] }
  0x32   :  { %302 = vmatprep.subr.mxu1 %v190_v16  ;;  %v166_v33 = vld [vmem:[#allocation7 + $0x18] sm:$0xff]  ;;  %v165_v35 = vld [vmem:[#allocation7 + $0x10] sm:$0xff]  ;;  %v164_v37 = vld [vmem:[#allocation7 + $0x8] sm:$0xff] }
  0x33   :  { %303 = vmatpush3.msra.mxu1 %v174_v17  ;;  %v179_v38 = vld [vmem:[#allocation7 + $0x80] sm:$0xff]  ;;  %v67_v43 = vld [vmem:[%s483_s2] sm:$0x3]  ;;  %s398_s2 = scalar_lea.vmem %s281_s14, 32 }
  0x34   :  { %304 = vmatprep.subr.mxu1 %v189_v18  ;;  %v163_v39 = vld [vmem:[#allocation7] sm:$0xff]  ;;  %v72_v45 = vrot.slane %v67_v43, %v71_v42  ;;  %v76_v46 = vrot.slane %v67_v43, %v75_v44  ;;  %v293_v54 = vld [vmem:[%s485_s4] ss:$0 sm:$0xff]  ;;  %p399_p1 = scmp.ne.s32.totalorder %s281_s14, %s398_s2  ;;  %p404_p3 = scmp.lt.s32.totalorder %s398_s2, %s398_s2 }
  0x35   :  { %305 = vmatpush3.msra.mxu1 %v173_v19 }
  0x36   :  { %306 = vmatprep.subr.mxu1 %v188_v20  ;;  %p405_p4 = por %p404_p3, %p403_p2 }
  0x37   :  { %307 = vmatpush3.msra.mxu1 %v172_v21 }
  0x38   :  { %308 = vmatprep.subr.mxu1 %v187_v22  ;;  %p406_p5 = pnand %p405_p4, %p399_p1 }
  0x39   :  { %309 = vmatpush3.msra.mxu1 %v171_v23 }
  0x3a   :  { %310 = vmatprep.subr.mxu1 %v186_v24 }
  0x3b   :  { %311 = vmatpush3.msra.mxu1 %v170_v25 }
  0x3c   :  { %312 = vmatprep.subr.mxu1 %v185_v26 }
  0x3d   :  { %313 = vmatpush3.msra.mxu1 %v169_v27 }
  0x3e   :  { %314 = vmatprep.subr.mxu1 %v184_v28 }
  0x3f   :  { %315 = vmatpush3.msra.mxu1 %v168_v29 }
  0x40   :  { %316 = vmatprep.subr.mxu1 %v183_v30 }
  0x41   :  { %317 = vmatpush3.msra.mxu1 %v167_v31 }
  0x42   :  { %318 = vmatprep.subr.mxu1 %v182_v32 }
  0x43   :  { %319 = vmatpush3.msra.mxu1 %v166_v33 }
  0x44   :  { %320 = vmatprep.subr.mxu1 %v181_v34 }
  0x45   :  { %321 = vmatpush3.msra.mxu1 %v165_v35 }
  0x46   :  { %322 = vmatprep.subr.mxu1 %v180_v36 }
  0x47   :  { %323 = vmatpush3.msra.mxu1 %v164_v37 }
  0x48   :  { %324 = vmatprep.subr.mxu1 %v179_v38 }
  0x49   :  { %325 = vmatpush3.msra.mxu1 %v163_v39 }
  0xed   :  { %v156_v47 = vpop.f32.mrf.mxu0 }
  0xee   :  { %v157_v48 = vadd.f32 %v156_v47, %v72_v45 }
  0xef   :  { %v158_v49 = vpop.f32.mrf.mxu0 }
  0xf0   :  { %v159_v50 = vadd.f32 %v158_v49, %v76_v46  ;;  %v161_v52 = vmax.f32 %v157_v48, 0.0 }
  0xf2   :  { %v162_v51 = vmax.f32 %v159_v50, 0.0 }
  0xf4   :  { %266 = vmatprep.mubr.f32.mxu1 %v162_v51 }
  0xf5   :  { %267 = vmatmul.mubr.f32.vlgmr.msra.gmra.mxu1 %v161_v52 }
 0x1b5   :  { %v326_v53 = vpop.f32.mrf.mxu1 }
 0x1b7   :  { %v327_v55 = vpop.f32.mrf.mxu1 }
 0x1b8   :  { %v328_v56 = vadd.f32 %v327_v55, %v326_v53 }
 0x1ba   :  { %v269_v57 = vadd.f32 %v328_v56, %v293_v54 }
 0x1bc   :  { %273 = vst.msk [vmem:[#allocation8] sm:$0x3] %vm272_vm2, %v269_v57 }
 0x1bd   :  { %409 = shalt.err (!%p406_p5)
}
 0x1be   :  { %283 = dma.vmem_to_hbm [thread:$0]  %s281_s14, 32, %s486_s5, [#allocation4]  }
 0x1bf   :  { %422 = dma.done.wait [#allocation4], 32  }
 0x1c0   :  { %423 = vsyncadd [#allocation4], 4294967264 }
 0x1c1   :  { %287 = vsyncpa [#allocation3], 1 }
 0x1c2   :  { %288 = vsyncpa [#allocation6], 1 }
 0x1c3   :  { %289 = vsyncpa [#allocation4], 1 }

</bundles_post_ra>
